<compile_context>
chip_gen: v7x
topology: tpu7x:2x2x1
jax: 0.10.0
libtpu: 0.0.40
codegen_flags: <defaults>
</compile_context>

<pallas_src>
import jax
import jax.numpy as jnp
from jax.experimental import pallas as pl
from jax.experimental.pallas import tpu as pltpu


def _round_up(x, m):
    return ((x + m - 1) // m) * m


def _patch_embed_kernel(p_ref, w_ref, b_ref, o_ref):
    # p_ref: (tm, K) bf16 (streamed), w_ref: (K, E_pad) bf16 (resident),
    # b_ref: (1, E_pad) f32 (resident), o_ref: (tm, E_pad).
    acc = jnp.dot(p_ref[...], w_ref[...], preferred_element_type=jnp.float32)
    o_ref[...] = (acc + b_ref[...]).astype(o_ref.dtype)


# Conservative VMEM budget that fits v7x's 64 MiB (and well under the 128 MiB
# of v5e/v6e once vmem_limit_bytes is raised to match).
_VMEM_BUDGET_BYTES = 40 * 1024 * 1024
_TM_CAP = 4096


def patch_embed_matmul(patches, w_pad, b_pad, out_cols, *, tm=None,
                       out_dtype=jnp.float32):
    """patches: [M, K] float, w_pad: [K_pad, E_pad] bf16, b_pad: [1, E_pad] f32.

    Returns [M, out_cols] = patches @ W + b, computed with bf16 operands and
    f32 accumulation."""
    M, K = patches.shape
    K_pad, E_pad = w_pad.shape
    out_itemsize = jnp.dtype(out_dtype).itemsize

    # VMEM bookkeeping (bytes): double-buffered input + output tiles, plus
    # weight/bias (counted double-buffered to stay conservative).
    # TODO(synk): pipeline_mode=pl.Buffered(1) on the constant-index weight/bias
    # specs would drop their second buffer; left at the default here.
    per_row = 2 * K_pad * 2 + 2 * E_pad * out_itemsize
    fixed = 2 * K_pad * E_pad * 2 + 2 * E_pad * 4

    if tm is None:
        t = max(16, (_VMEM_BUDGET_BYTES - fixed) // per_row)   # VMEM-budgeted
        t = min(t, _TM_CAP)
        t = min(t, max(16, _round_up(pl.cdiv(M, 4), 16)))      # >= 2 (aim 4) grid steps
        tm = max(16, (t // 16) * 16)                           # bf16 sublane multiple
    tm = int(tm)

    # Only glue on the streamed operand: optional single pad HLO (when K was
    # rounded up to a 128-multiple, i.e. K >= 128 and misaligned) + bf16 cast.
    # allow_input_fusion lets XLA fold this, with the patchify transpose, into
    # the kernel's input DMA instead of an HBM round-trip.
    if K_pad != K:
        patches = jnp.pad(patches, ((0, 0), (0, K_pad - K)))
    p = patches.astype(jnp.bfloat16)

    grid = (pl.cdiv(M, tm),)   # ragged trailing block handled by Pallas; no M padding

    vmem_need = fixed + per_row * tm
    vmem_limit = int(min(max(vmem_need * 3 // 2, 16 * 1024 * 1024),
                         48 * 1024 * 1024))

    out = pl.pallas_call(
        _patch_embed_kernel,
        out_shape=jax.ShapeDtypeStruct((M, E_pad), out_dtype),
        grid=grid,
        in_specs=[
            pl.BlockSpec((tm, K_pad), lambda i: (i, 0)),     # patch rows, streamed
            pl.BlockSpec((K_pad, E_pad), lambda i: (0, 0)),  # weight, resident
            pl.BlockSpec((1, E_pad), lambda i: (0, 0)),      # bias, resident
        ],
        out_specs=pl.BlockSpec((tm, E_pad), lambda i: (i, 0)),
        compiler_params=pltpu.CompilerParams(
            dimension_semantics=("parallel",),
            vmem_limit_bytes=vmem_limit,
            allow_input_fusion=[True, False, False],
        ),
        cost_estimate=pl.CostEstimate(
            flops=2 * M * K_pad * E_pad,
            transcendentals=0,
            bytes_accessed=(M * K_pad * 2 + K_pad * E_pad * 2 + E_pad * 4
                            + M * E_pad * out_itemsize),
        ),
    )(p, w_pad, b_pad)

    return out[:, :out_cols]


class PatchEmbed:
    """Image to Patch Embedding (Pallas TPU implementation of BEiT PatchEmbed)."""

    def __init__(self, img_size=(16, 16), patch_size=4, in_chans=4, embed_dim=32,
                 key=jax.random.PRNGKey(0)):
        self.img_size = (img_size, img_size) if isinstance(img_size, int) else tuple(img_size)
        self.patch_size = (patch_size, patch_size) if isinstance(patch_size, int) else tuple(patch_size)
        self.in_chans = in_chans
        self.embed_dim = embed_dim
        self.patch_shape = (self.img_size[0] // self.patch_size[0],
                            self.img_size[1] // self.patch_size[1])
        self.num_patches = self.patch_shape[0] * self.patch_shape[1]

        # Deterministic init mimicking nn.Conv2d default (kaiming-uniform-ish).
        kh, kw = self.patch_size
        fan_in = in_chans * kh * kw
        bound = 1.0 / jnp.sqrt(fan_in)
        k_w, k_b = jax.random.split(key)
        # Conv weight layout: (embed_dim, in_chans, kh, kw) -- matches nn.Conv2d.
        self.conv_weight = jax.random.uniform(
            k_w, (embed_dim, in_chans, kh, kw), jnp.float32, -bound, bound)
        self.conv_bias = jax.random.uniform(
            k_b, (embed_dim,), jnp.float32, -bound, bound)
        # Matmul form: (in_chans*kh*kw, embed_dim), K-order = (c, kh, kw).
        self.w_mat = self.conv_weight.reshape(embed_dim, fan_in).T

        # Lane alignment: pad K only when >= 128 and misaligned (a block whose
        # last dim equals the full array dim is legal); always pad E to a
        # 128-multiple so output stores are lane-dense (unmasked vst).
        self.fan_in = fan_in
        self.k_pad = fan_in if fan_in <= 128 else _round_up(fan_in, 128)
        self.e_pad = _round_up(embed_dim, 128)

        self.w_pad = jnp.pad(self.w_mat.astype(jnp.bfloat16),
                             ((0, self.k_pad - fan_in), (0, self.e_pad - embed_dim)))
        self.b_pad = jnp.pad(self.conv_bias,
                             (0, self.e_pad - embed_dim)).reshape(1, self.e_pad)

    def __call__(self, x, position_embedding=None):
        # x: [B, C, H, W] (NCHW, like PyTorch)
        B, C, H, W = x.shape
        ph, pw = self.patch_size
        Hp, Wp = H // ph, W // pw

        # Patchify glue: [B, C, Hp, ph, Wp, pw] -> [B, Hp, Wp, C, ph, pw]
        # (allow_input_fusion lets XLA fold this into the kernel's input DMA).
        patches = x.reshape(B, C, Hp, ph, Wp, pw)
        patches = patches.transpose(0, 2, 4, 1, 3, 5)
        patches = patches.reshape(B * Hp * Wp, C * ph * pw)

        out = patch_embed_matmul(patches, self.w_pad, self.b_pad, self.embed_dim)
        out = out.reshape(B, Hp * Wp, self.embed_dim)

        if position_embedding is not None:
            # TODO(synk): bicubic F.interpolate (align_corners=False) has no exact
            # Pallas equivalent; handled here in plain JAX (boundary behavior may
            # differ slightly from PyTorch).
            pe = position_embedding.reshape(1, self.patch_shape[0], self.patch_shape[1], -1)
            pe = jax.image.resize(pe, (1, Hp, Wp, pe.shape[-1]), method="bicubic")
            out = out + pe.reshape(1, Hp * Wp, -1)

        return out, (Hp, Wp)


if __name__ == "__main__":
    key = jax.random.PRNGKey(0)
    k_x, k_param = jax.random.split(key)

    B, C, H, W = 2, 4, 16, 16
    patch_size = 4
    embed_dim = 32

    x = jax.random.normal(k_x, (B, C, H, W), jnp.float32)

    module = PatchEmbed(img_size=(H, W), patch_size=patch_size,
                        in_chans=C, embed_dim=embed_dim, key=k_param)

    out, (Hp, Wp) = module(x)
    out = jax.block_until_ready(out)

    assert out.shape == (B, Hp * Wp, embed_dim), out.shape
    assert (Hp, Wp) == (H // patch_size, W // patch_size)

    # 1) Tight check vs a plain-JAX matmul using the same bf16 operands / f32 acc.
    patches = x.reshape(B, C, Hp, patch_size, Wp, patch_size)
    patches = patches.transpose(0, 2, 4, 1, 3, 5).reshape(B * Hp * Wp, -1)
    ref_bf16 = jnp.dot(patches.astype(jnp.bfloat16),
                       module.w_mat.astype(jnp.bfloat16),
                       preferred_element_type=jnp.float32)
    ref_bf16 = (ref_bf16 + module.conv_bias[None, :]).reshape(B, Hp * Wp, embed_dim)
    assert jnp.allclose(out, ref_bf16, atol=1e-4, rtol=1e-4)

    # 2) Semantic check vs f32 lax.conv (same as nn.Conv2d stride=kernel); loose
    #    tolerance accounts only for bf16 operand rounding.
    ref = jax.lax.conv_general_dilated(
        x, module.conv_weight, window_strides=(patch_size, patch_size),
        padding="VALID", dimension_numbers=("NCHW", "OIHW", "NCHW"))
    ref = ref + module.conv_bias[None, :, None, None]
    ref = ref.reshape(B, embed_dim, Hp * Wp).transpose(0, 2, 1)
    assert jnp.allclose(out, ref, atol=2e-2, rtol=2e-2)

    print("KERNEL_OK")
</pallas_src>

<mosaic_0001>
module attributes {stable_mosaic.version = 11 : i64} {
  func.func @_patch_embed_kernel(%arg0: i32, %arg1: memref<16x64xbf16, #tpu.memory_space<vmem>>, %arg2: memref<64x128xbf16, #tpu.memory_space<vmem>>, %arg3: memref<1x128xf32, #tpu.memory_space<vmem>>, %arg4: memref<16x128xf32, #tpu.memory_space<vmem>>) attributes {dimension_semantics = [#tpu.dimension_semantics<parallel>], iteration_bounds = array<i64: 2>, scalar_prefetch = 0 : i64, scratch_operands = 0 : i64, tpu.core_type = #tpu.core_type<tc>, window_params = [{transform_indices = @transform_0, window_bounds = array<i64: 16, 64>}, {pipeline_mode = #tpu.pipeline_mode<synchronous>, transform_indices = @transform_1, window_bounds = array<i64: 64, 128>}, {pipeline_mode = #tpu.pipeline_mode<synchronous>, transform_indices = @transform_2, window_bounds = array<i64: 1, 128>}, {transform_indices = @transform_3, window_bounds = array<i64: 16, 128>}]} {
    %c0 = arith.constant 0 : index
    %c0_0 = arith.constant 0 : index
    %0 = vector.load %arg1[%c0, %c0_0] : memref<16x64xbf16, #tpu.memory_space<vmem>>, vector<16x64xbf16>
    %c0_1 = arith.constant 0 : index
    %c0_2 = arith.constant 0 : index
    %1 = vector.load %arg2[%c0_1, %c0_2] : memref<64x128xbf16, #tpu.memory_space<vmem>>, vector<64x128xbf16>
    %cst = arith.constant dense<0.000000e+00> : vector<16x128xf32>
    %2 = tpu.matmul %0, %1, %cst {dimension_numbers = #tpu.dot_dimension_numbers<[1], [0], [0], [1], [0, 0, 1, 1], [], []>} : vector<16x64xbf16>, vector<64x128xbf16>, vector<16x128xf32> -> vector<16x128xf32>
    %c0_3 = arith.constant 0 : index
    %c0_4 = arith.constant 0 : index
    %3 = vector.load %arg3[%c0_3, %c0_4] : memref<1x128xf32, #tpu.memory_space<vmem>>, vector<1x128xf32>
    %4 = vector.broadcast %3 : vector<1x128xf32> to vector<16x128xf32>
    %5 = arith.addf %2, %4 : vector<16x128xf32>
    %c0_5 = arith.constant 0 : index
    %c0_6 = arith.constant 0 : index
    %6 = vector.load %arg4[%c0_5, %c0_6] : memref<16x128xf32, #tpu.memory_space<vmem>>, vector<16x128xf32>
    tpu.vector_store %arg4[%c0_5, %c0_6], %5 {strides = array<i32>} : memref<16x128xf32, #tpu.memory_space<vmem>>, vector<16x128xf32>,
    return
  }
  func.func @transform_0(%arg0: i32) -> (i32, i32) {
    %c0_i32 = arith.constant 0 : i32
    %c0_i32_0 = arith.constant 0 : i32
    return %arg0, %c0_i32 : i32, i32
  }
  func.func @transform_1(%arg0: i32) -> (i32, i32) {
    %c0_i32 = arith.constant 0 : i32
    %c0_i32_0 = arith.constant 0 : i32
    %c0_i32_1 = arith.constant 0 : i32
    return %c0_i32, %c0_i32_0 : i32, i32
  }
  func.func @transform_2(%arg0: i32) -> (i32, i32) {
    %c0_i32 = arith.constant 0 : i32
    %c0_i32_0 = arith.constant 0 : i32
    %c0_i32_1 = arith.constant 0 : i32
    return %c0_i32, %c0_i32_0 : i32, i32
  }
  func.func @transform_3(%arg0: i32) -> (i32, i32) {
    %c0_i32 = arith.constant 0 : i32
    %c0_i32_0 = arith.constant 0 : i32
    return %arg0, %c0_i32 : i32, i32
  }
}

</mosaic_0001>

<bundles_post_ra>
// kernel: tpu_custom_call.1
= control target key start
LH: loop header
LB: loop body
LE: loop exit
PB: predicated region body
PF: predicated region fallthrough
CT: control target
= control target key end

     0   :  { %8 = vsyncpa [#allocation3], 0  ;;  %s877_s0 = inlined_call_operand.hbm [shape: bf16[32,64], index: 0, kind: input, shape index: {}]   ;;  %s878_s1 = inlined_call_operand.hbm [shape: bf16[64,128], index: 1, kind: input, shape index: {}]   ;;  %s879_s2 = inlined_call_operand.vmem [shape: f32[1,128], index: 2, kind: input, shape index: {}]   ;;  %s880_s3 = inlined_call_operand.hbm [shape: f32[32,128], index: 3, kind: output, shape index: {}]  }
   0x1   :  { %10 = vsyncpa [#allocation3 + $0x1], 0 }
   0x2   :  { %11 = vsyncpa [#allocation6], 0 }
   0x3   :  { %12 = vsyncpa [#allocation4], 0 }
   0x4   :  { %14 = vsyncpa [#allocation4 + $0x1], 0  ;;  %s666_s12 = smov 0   ;;  %s668_s13 = smov 0  }
   0x5   :  { %s670_s14 = smov 0   ;;  %s672_s15 = smov 0  }
   0x6 LB: > { %s687_s16 = sadd.s32 4294967295, %s635_s15   ;;  %s397_s17 = sadd.s32 4294967294, %s635_s15   ;;  %s635_s15 = sphi %s672_s15, %s900_s15   ;;  %s631_s14 = sphi %s670_s14, %s899_s14   ;;  %s627_s13 = sphi %s668_s13, %s898_s13   ;;  %s623_s12 = sphi %s666_s12, %s897_s12  }
   0x7   : > { %p40_p0 = scmp.ne.s32.totalorder %s627_s13, %s623_s12  ;;  %p881_p1 = scmp.eq.s32.totalorder %s687_s16, 0 }
   0x8   : > { %p112_p3 = scmp.eq.s32.totalorder %s397_s17, 1  ;;  %p398_p5 = scmp.ge.s32.totalorder %s635_s15, 1 }
   0x9   : > { %p696_p4 = por %p881_p1, %p40_p0  ;;  %p119_p7 = scmp.lt.s32.totalorder %s635_s15, 3 }
   0xa   : > { %p701_p6 = por %p112_p3, %p40_p0  ;;  %s637_s21 = smov [#allocation5]  }
   0xb   : > { %s884_s18 = scalar_select %p696_p4, 1, 0 }
   0xc   : > { %s885_s19 = scalar_select %p701_p6, 1, 0 }
   0xd   : > { %p706_p8 = pnand %p398_p5, %p119_p7  ;;  %s131_s22 = sshll.u32 %s637_s21, 4  ;;  %s710_s22 = int_to_ptr.vmem [resolvable:$true] %s131_s22 }
   0xe   : > { %s722_s24 = sadd.s32 1, %s635_s15   ;;  %s27_s25 = sadd.s32 1, %s631_s14 }
   0xf   : > { %s886_s20 = scalar_select %p706_p8, 1, 0 }
  0x10   : > { %p447_p9 = pneg %p706_p8  ;;  %s24_s26 = ssub.s32 %s635_s15, %s722_s24 }
  0x11   : > { %s507_s29 = scalar_lea.hbm %s878_s1, 512 }
  0x12   : > { %p717_p11 = pnand %p447_p9, %p881_p1  ;;  %p508_p12 = scmp.ne.s32.totalorder %s878_s1, %s507_s29 }
  0x13   : > { %p514_p5 = scmp.lt.u32.totalorder %s507_s29, %s878_s1 }
  0x14   : > { %p509_p13 = pneg %p717_p11 }
  0x16   : > { %p510_p0 = pnand %p509_p13, %p508_p12 }
  0x18   : > { %p511_p3 = pneg %p510_p0 }
  0x1a   : > { %p516_p7 = pnand %p514_p5, %p511_p3 }
  0x1c   : > { %519 = shalt.err (!%p516_p7)
}
  0x1d   : > { %s520_s7 = scalar_lea.vmem %s710_s22, 512  ;;  %p528_p2 = scmp.lt.s32.totalorder %s710_s22, %s710_s22 }
  0x1e   : > { %p521_p9 = scmp.ne.s32.totalorder %s710_s22, %s520_s7  ;;  %p529_p6 = scmp.lt.s32.totalorder %s520_s7, %s520_s7 }
  0x20   : > { %p523_p10 = pnand %p521_p9, %p509_p13  ;;  %p530_p4 = por %p529_p6, %p528_p2 }
  0x22   : > { %p524_p1 = pneg %p523_p10 }
  0x24   : > { %p531_p8 = pnand %p530_p4, %p524_p1 }
  0x26   : > { %534 = shalt.err (!%p531_p8)
}
  0x27   : > { %s638_s8 = smov 64   ;;  %s639_s9 = smov 4  }
  0x28   : > { %450 = dma.hbm_to_vmem [thread:$0]  (!%p717_p11), %s878_s1, 512, %s710_s22, [#allocation6], %s638_s8, %s638_s8, %s639_s9  }
  0x29   : > { %p25_p1 = scmp.eq.s32.totalorder %s24_s26, 0  ;;  %p34_p2 = scmp.ne.s32.totalorder %s631_s14, %s627_s13 }
  0x2a   : > { %p35_p4 = scmp.eq.s32.totalorder %s635_s15, 0  ;;  %p460_p6 = scmp.lt.s32.totalorder %s635_s15, 2 }
  0x2b   : > { %s756_s17 = scalar_select %p25_p1, %s631_s14, %s27_s25  }
  0x2c   : > { %p36_p8 = por %p35_p4, %p34_p2  ;;  %p888_p10 = scmp.eq.s32.totalorder %s687_s16, 1 }
  0x2d   : > { %s148_s23 = sand.u32 1, %s631_s14   ;;  %s420_s27 = sshll.u32 %s635_s15, 7 }
  0x2e   : > { %p760_p12 = por %p888_p10, %p34_p2  ;;  %s401_s28 = sshll.u32 %s148_s23, 3 }
  0x2f   : > { %s769_s4 = scalar_lea.hbm %s877_s0, %s420_s27  ;;  %s152_s22 = scalar_lea.vmem [#allocation2], %s401_s28 }
  0x30   : > { %s159_s25 = sshll.u32 %s152_s22, 4  ;;  %p771_p11 = pnand %p460_p6, %p36_p8  ;;  %s775_s25 = int_to_ptr.vmem [resolvable:$true] %s159_s25 }
  0x31   : > { %s777_s5 = scalar_lea.sflag [#allocation3], %s148_s23  ;;  %s535_s6 = scalar_lea.hbm %s769_s4, 128 }
  0x32   : > { %p536_p13 = scmp.ne.s32.totalorder %s769_s4, %s535_s6  ;;  %p537_p0 = pneg %p771_p11 }
  0x33   : > { %s540_s11 = scalar_lea.hbm %s877_s0, 256  ;;  %p541_p7 = scmp.lt.u32.totalorder %s769_s4, %s877_s0 }
  0x34   : > { %p538_p3 = pnand %p537_p0, %p536_p13  ;;  %p542_p9 = scmp.lt.u32.totalorder %s540_s11, %s535_s6 }
  0x35   : > { %p544_p2 = scmp.lt.u32.totalorder %s535_s6, %s769_s4 }
  0x36   : > { %p539_p5 = pneg %p538_p3  ;;  %p543_p1 = por %p542_p9, %p541_p7 }
  0x38   : > { %p545_p4 = por %p544_p2, %p543_p1 }
  0x3a   : > { %p546_p6 = pnand %p545_p4, %p539_p5 }
  0x3c   : > { %549 = shalt.err (!%p546_p6)
}
  0x3d   : > { %s550_s23 = scalar_lea.vmem %s775_s25, 128  ;;  %s640_s29 = smov [#allocation2]  }
  0x3e   : > { %p551_p8 = scmp.ne.s32.totalorder %s775_s25, %s550_s23  ;;  %s555_s30 = sshll.u32 %s640_s29, 4  ;;  %s556_s30 = int_to_ptr.vmem [resolvable:$false] %s555_s30 }
  0x3f   : > { %s557_s22 = scalar_lea.vmem %s556_s30, 256  ;;  %p558_p3 = scmp.lt.s32.totalorder %s775_s25, %s556_s30 }
  0x40   : > { %p553_p10 = pnand %p551_p8, %p537_p0  ;;  %p559_p7 = scmp.lt.s32.totalorder %s557_s22, %s550_s23 }
  0x42   : > { %p554_p13 = pneg %p553_p10  ;;  %p560_p9 = por %p559_p7, %p558_p3 }
  0x44   : > { %p561_p1 = pnand %p560_p9, %p554_p13 }
  0x46   : > { %564 = shalt.err (!%p561_p1)
}
  0x47   : > { %454 = dma.hbm_to_vmem [thread:$0]  (!%p771_p11), %s769_s4, 128, %s775_s25, %s777_s5, %s638_s8, %s638_s8, %s639_s9  }
  0x48   : > { %p891_p0 = scmp.ne.s32.totalorder %s886_s20, 0 }
  0x49   : > { %s811_s6 = sand.u32 (!%p891_p0), 1, %s627_s13   ;;  %p892_p5 = scmp.ne.s32.totalorder (!%p891_p0), %s884_s18, 0 }
  0x4a   : > { %171 = sbr.rel (%p891_p0) target bundleno = 333 (0x14d), region = 32  ;;  %s405_s7 = sshll.u32 (!%p891_p0), %s811_s6, 3 }
  0x4b   : > { %s174_s10 = scalar_lea.sflag (!%p891_p0), [#allocation3], %s811_s6  ;;  %s177_s11 = scalar_lea.vmem (!%p891_p0), [#allocation2], %s405_s7 }
  0x51   : > { %610 = dma.done.wait (%p892_p5), %s174_s10, 128  }
  0x52   : > { %612 = vsyncadd (%p892_p5), %s174_s10, 4294967168  ;;  %p893_p2 = scmp.eq.s32.totalorder %s687_s16, 0 }
  0x54   : > { %614 = dma.done.wait (%p893_p2), [#allocation6], 512   ;;  %p894_p11 = pmov %p893_p2 }
  0x55   : > { %v641_v0 = vmov 0.0   ;;  %vm642_vm0 = vmmov 0   ;;  %v502_v1 = vld [vmem:[#allocation5] sm:$0xff]   ;;  %v503_v2 = vld [vmem:[#allocation5 + $0x8] sm:$0xff]   ;;  %v504_v3 = vld [vmem:[#allocation5 + $0x10] sm:$0xff]   ;;  %vm253_vm1 = vcmask 523264  }
  0x56   : > { %616 = vsyncadd (%p894_p11), [#allocation6], 4294966784  ;;  %427 = vmatprep.subr.bf16.mxu0 %v641_v0  ;;  %435 = vmatprep.mubr.msk.bf16.mxu0 %vm642_vm0, %v641_v0  ;;  %v505_v4 = vld [vmem:[#allocation5 + $0x18] sm:$0xff]   ;;  %s407_s18 = sshll.u32 %s811_s6, 4  ;;  %v408_v6 = vld [vmem:[%s879_s2] ss:$0 sm:$0xff] }
  0x57   : > { %428 = vmatpush3.bf16.msra.mxu0 %v502_v1  ;;  %v506_v5 = vld [vmem:[%s177_s11] sm:$0xff]   ;;  %s203_s9 = scalar_lea.vmem [#allocation7], %s407_s18  ;;  %s421_s25 = sshll.u32 %s687_s16, 8 }
  0x58   : > { %429 = vmatprep.subr.bf16.mxu0 %v641_v0  ;;  %s314_s4 = sshll.u32 %s203_s9, 4  ;;  %s833_s27 = scalar_lea.hbm %s880_s3, %s421_s25  ;;  %s828_s4 = int_to_ptr.vmem [resolvable:$true] %s314_s4 }
  0x59   : > { %s301_s28 = scalar_lea.sflag [#allocation4], %s811_s6  ;;  %s565_s16 = scalar_lea.vmem %s828_s4, 256 }
  0x5a   : > { %p566_p4 = scmp.ne.s32.totalorder %s828_s4, %s565_s16  ;;  %s643_s23 = smov [#allocation7]  }
  0x5b   : > { %430 = vmatpush3.bf16.msra.mxu0 %v503_v2  ;;  %s569_s29 = sshll.u32 %s643_s23, 4  ;;  %s570_s29 = int_to_ptr.vmem [resolvable:$false] %s569_s29 }
  0x5c   : > { %431 = vmatprep.subr.bf16.mxu0 %v641_v0  ;;  %p567_p6 = pnand %p566_p4, %p760_p12  ;;  %s571_s30 = scalar_lea.vmem %s570_s29, 512 }
  0x5d   : > { %p572_p10 = scmp.lt.s32.totalorder %s828_s4, %s570_s29  ;;  %p573_p13 = scmp.lt.s32.totalorder %s571_s30, %s565_s16 }
  0x5e   : > { %p568_p8 = pneg %p567_p6 }
  0x5f   : > { %432 = vmatpush3.bf16.msra.mxu0 %v504_v3  ;;  %p574_p3 = por %p573_p13, %p572_p10 }
  0x60   : > { %433 = vmatprep.subr.bf16.mxu0 %v641_v0 }
  0x61   : > { %p575_p7 = pnand %p574_p3, %p568_p8 }
  0x63   : > { %434 = vmatpush3.bf16.msra.mxu0 %v505_v4 }
  0x66   : > { %436 = vmatmul.mubr.msk.bf16.vlgmr.msra.gmra.mrb[0].mxu0 %vm253_vm1, %v506_v5 }
 0x139   : > { %v291_v7 = vpop.f32.mrb[0].mxu0 }
 0x13a   : > { %v292_v8 = vadd.f32 %v408_v6, %v291_v7  ;;  %v437_v9 = vpop.f32.mrb[1].mxu0 }
 0x13b   : > { %v294_v10 = vpop.f32.mrb[2].mxu0 }
 0x13c   : > { %298 = vst [vmem:[%s203_s9] sm:$0xff] %v292_v8  ;;  %v295_v11 = vadd.f32 %v408_v6, %v294_v10  ;;  %v438_v12 = vpop.f32.mrb[3].mxu0 }
 0x13e   : > { %299 = vst [vmem:[%s203_s9 + $0x8] sm:$0xff] %v295_v11 }
 0x13f   : > { %578 = shalt.err (!%p575_p7)
}
 0x140   : > { %s579_s22 = scalar_lea.hbm %s833_s27, 256  ;;  %s583_s11 = scalar_lea.hbm %s880_s3, 512 }
 0x141   : > { %p580_p9 = scmp.ne.s32.totalorder %s833_s27, %s579_s22  ;;  %p584_p5 = scmp.lt.u32.totalorder %s833_s27, %s880_s3 }
 0x142   : > { %p585_p2 = scmp.lt.u32.totalorder %s583_s11, %s579_s22  ;;  %p587_p4 = scmp.lt.u32.totalorder %s579_s22, %s833_s27 }
 0x143   : > { %p581_p1 = pnand %p580_p9, %p760_p12 }
 0x144   : > { %p586_p11 = por %p585_p2, %p584_p5 }
 0x145   : > { %p582_p0 = pneg %p581_p1 }
 0x146   : > { %p588_p6 = por %p587_p4, %p586_p11 }
 0x148   : > { %p589_p8 = pnand %p588_p6, %p582_p0 }
 0x14a   : > { %592 = shalt.err (!%p589_p8)
}
 0x14b   : > { %s644_s8 = smov 128   ;;  %s645_s9 = smov 8  }
 0x14c   : > { %445 = dma.vmem_to_hbm [thread:$0]  (%p760_p12), %s828_s4, 256, %s833_s27, %s301_s28, %s644_s8, %s644_s8, %s645_s9  }
 0x14d PF: > { %s329_s25 = sand.u32 1, %s623_s12   ;;  %p895_p10 = scmp.ne.s32.totalorder %s885_s19, 0 }
 0x14e   : > { %p896_p13 = scmp.ge.s32.totalorder %s635_s15, 2  ;;  %s330_s26 = scalar_lea.sflag [#allocation4], %s329_s25 }
 0x150   : > { %p456_p3 = pnand %p896_p13, %p895_p10 }
 0x152   : > { %618 = dma.done.wait (!%p456_p3), %s330_s26, 256  }
 0x153   : > { %620 = vsyncadd (!%p456_p3), %s330_s26, 4294967040  ;;  %p17_p7 = scmp.ge.s32.totalorder %s722_s24, 4   ;;  %s897_s12 = smov %s627_s13 }
 0x154   : > { %s898_s13 = smov %s631_s14  ;;  %s899_s14 = smov %s756_s17 }
 0x155   : > { %s900_s15 = smov %s722_s24  ;;  %19 = sbr.rel (!%p17_p7) target bundleno = 6 (0x6), region = 81 }
 0x15c   :  { %335 = vsyncpa [#allocation3], 1 }
 0x15d   :  { %337 = vsyncpa [#allocation3 + $0x1], 1 }
 0x15e   :  { %338 = vsyncpa [#allocation6], 1 }
 0x15f   :  { %339 = vsyncpa [#allocation4], 1 }
 0x160   :  { %341 = vsyncpa [#allocation4 + $0x1], 1 }

</bundles_post_ra>
